<compile_context>
chip_gen: v7x
topology: tpu7x:2x2x1
jax: 0.10.0
libtpu: 0.0.40
codegen_flags: <defaults>
</compile_context>

<pallas_src>
import functools
import math

import jax
import jax.numpy as jnp
from jax.experimental import pallas as pl
from jax.experimental.pallas import tpu as pltpu

ALPHA = 0.1
BETA = 1.0
NUM_CLASSES = 5
_LOG_EPS = math.log(1e-7)   # lower bound of clamp(softmax, 1e-7, 1.0).log()
_TN_MAX = 16384             # default lanes per grid step (multiple of 128)


def _sce_kernel(x_ref, t_ref, out_ref, acc_ref, *, num_classes, alpha, beta,
                inv_n):
    # x_ref  : (C, TN) logits tile (class-major: batch on lanes)
    # t_ref  : (1, TN) int32 target tile (-1 marks batch padding)
    # out_ref: (1, 1)  f32 scalar loss in SMEM (written on the last step only)
    # acc_ref: (1, TN) f32 running per-lane loss accumulator (VMEM scratch)
    step = pl.program_id(0)

    @pl.when(step == 0)
    def _init():
        acc_ref[...] = jnp.zeros_like(acc_ref)

    tgt = t_ref[...]                                            # (1, TN) i32

    # Per-class rows, unrolled: stays on the VPU/EUP, no XLU reduce in the loop.
    rows = [x_ref[c:c + 1, :].astype(jnp.float32) for c in range(num_classes)]

    m = rows[0]
    for c in range(1, num_classes):
        m = jnp.maximum(m, rows[c])                             # (1, TN)

    shifted = [r - m for r in rows]
    sumexp = jnp.exp(shifted[0])
    for c in range(1, num_classes):
        sumexp = sumexp + jnp.exp(shifted[c])
    logsum = jnp.log(sumexp)

    # log_softmax at the target class via masked selects (no one-hot tensor).
    # Padded lanes (tgt == -1) match no class -> lp == 0 -> zero loss below.
    lp = jnp.zeros_like(m)
    for c in range(num_classes):
        lp = lp + jnp.where(tgt == c, shifted[c] - logsum, 0.0)

    # CE_row  = -lp
    # RCE_row = -log(clamp(softmax_target, 1e-7, 1)) = -max(lp, log(1e-7))
    loss = (-(jnp.float32(alpha) * lp)
            - jnp.float32(beta) * jnp.maximum(lp, jnp.float32(_LOG_EPS)))
    acc_ref[...] += loss

    @pl.when(step == pl.num_programs(0) - 1)
    def _finalize():
        out_ref[0, 0] = jnp.sum(acc_ref[...]) * jnp.float32(inv_n)


def _round_up(x, m):
    return ((x + m - 1) // m) * m


def symmetric_cross_entropy(logits, targets, *, alpha=ALPHA, beta=BETA,
                            block_n=None):
    """logits: (N, C) float, targets: (N,) int.  reduction='mean' only."""
    # TODO(synk): only the 'mean' reduction path (the PyTorch default) is
    # implemented; 'sum' / 'none' would need a different finalize / output.
    # TODO(synk): v7x dual-TensorCore batch split (leading "parallel" grid axis
    # with per-core partial sums) not implemented; single-axis reduction only.
    n, c = logits.shape

    tn_cap = _TN_MAX if block_n is None else block_n
    tn = min(tn_cap, _round_up(n, 128))
    tn = _round_up(tn, 128)                 # lanes per step, multiple of 128
    n_pad = _round_up(n, tn)
    num_blocks = n_pad // tn

    # Class-major, lane-dense layout.  Keep the input dtype (upcast in-kernel);
    # pad batch with zero logits and target=-1 (contributes exactly 0 loss).
    x_t = jnp.pad(logits.T, ((0, 0), (0, n_pad - n)))           # (C, N_pad)
    tgt = jnp.pad(targets.astype(jnp.int32), (0, n_pad - n),
                  constant_values=-1).reshape(1, n_pad)         # (1, N_pad)

    kernel = functools.partial(_sce_kernel, num_classes=c, alpha=alpha,
                               beta=beta, inv_n=1.0 / n)

    out = pl.pallas_call(
        kernel,
        out_shape=jax.ShapeDtypeStruct((1, 1), jnp.float32),
        grid_spec=pltpu.PrefetchScalarGridSpec(
            num_scalar_prefetch=0,
            grid=(num_blocks,),
            in_specs=[
                pl.BlockSpec((c, tn), lambda i: (0, i)),
                pl.BlockSpec((1, tn), lambda i: (0, i)),
            ],
            out_specs=pl.BlockSpec(memory_space=pltpu.MemorySpace.SMEM),
            scratch_shapes=[pltpu.VMEM((1, tn), jnp.float32)],
        ),
        compiler_params=pltpu.CompilerParams(
            dimension_semantics=("arbitrary",)),
    )(x_t, tgt)
    return out[0, 0]


def _reference(logits, targets, alpha=ALPHA, beta=BETA):
    # pure-JAX reference mirroring the PyTorch forward (reduction='mean')
    x = logits.astype(jnp.float32)
    _, c = x.shape
    log_softmax = jax.nn.log_softmax(x, axis=1)
    softmax = jax.nn.softmax(x, axis=1)
    onehot = jax.nn.one_hot(targets, c, dtype=jnp.float32)
    ce = jnp.mean(-jnp.sum(onehot * log_softmax, axis=1))
    rce = jnp.mean(-jnp.sum(onehot * jnp.log(jnp.clip(softmax, 1e-7, 1.0)),
                            axis=1))
    return alpha * ce + beta * rce


if __name__ == "__main__":
    key = jax.random.PRNGKey(0)
    k1, k2, k3, k4 = jax.random.split(key, 4)

    # Small test at module-consistent shapes.
    batch = 8
    logits = jax.random.normal(k1, (batch, NUM_CLASSES), dtype=jnp.float32) * 2.0
    targets = jax.random.randint(k2, (batch,), 0, NUM_CLASSES, dtype=jnp.int32)
    loss = jax.block_until_ready(symmetric_cross_entropy(logits, targets))
    ref = jax.block_until_ready(_reference(logits, targets))
    assert jnp.allclose(loss, ref, rtol=1e-5, atol=1e-5), (loss, ref)

    # Second small test exercising the multi-block grid + batch padding path.
    batch2 = 300
    logits2 = jax.random.normal(k3, (batch2, NUM_CLASSES), dtype=jnp.float32) * 2.0
    targets2 = jax.random.randint(k4, (batch2,), 0, NUM_CLASSES, dtype=jnp.int32)
    loss2 = jax.block_until_ready(
        symmetric_cross_entropy(logits2, targets2, block_n=128))
    ref2 = jax.block_until_ready(_reference(logits2, targets2))
    assert jnp.allclose(loss2, ref2, rtol=1e-5, atol=1e-5), (loss2, ref2)

    print("KERNEL_OK")
</pallas_src>

<mosaic_0001>
module attributes {stable_mosaic.version = 11 : i64} {
  func.func @_sce_kernel(%arg0: i32, %arg1: memref<5x128xf32, #tpu.memory_space<vmem>>, %arg2: memref<1x128xi32, #tpu.memory_space<vmem>>, %arg3: memref<1x1xf32, #tpu.memory_space<smem>>, %arg4: memref<1x128xf32, #tpu.memory_space<vmem>>) attributes {dimension_semantics = [#tpu.dimension_semantics<arbitrary>], iteration_bounds = array<i64: 1>, scalar_prefetch = 0 : i64, scratch_operands = 1 : i64, tpu.core_type = #tpu.core_type<tc>, window_params = [{transform_indices = @transform_0, window_bounds = array<i64: 5, 128>}, {transform_indices = @transform_1, window_bounds = array<i64: 1, 128>}, {transform_indices = @transform_2, window_bounds = array<i64: 1, 1>}]} {
    %c0_i32 = arith.constant 0 : i32
    %0 = arith.cmpi eq, %arg0, %c0_i32 : i32
    %1 = arith.extui %0 : i1 to i32
    %c0_i32_0 = arith.constant 0 : i32
    %2 = arith.cmpi ne, %1, %c0_i32_0 : i32
    scf.if %2 {
      %cst_24 = arith.constant 0.000000e+00 : f32
      %74 = vector.broadcast %cst_24 : f32 to vector<1x128xf32>
      %c0_25 = arith.constant 0 : index
      %c0_26 = arith.constant 0 : index
      %75 = vector.load %arg4[%c0_25, %c0_26] : memref<1x128xf32, #tpu.memory_space<vmem>>, vector<1x128xf32>
      tpu.vector_store %arg4[%c0_25, %c0_26], %74 {strides = array<i32>} : memref<1x128xf32, #tpu.memory_space<vmem>>, vector<1x128xf32>,
    } else {
    }
    %c0 = arith.constant 0 : index
    %c0_1 = arith.constant 0 : index
    %3 = vector.load %arg2[%c0, %c0_1] : memref<1x128xi32, #tpu.memory_space<vmem>>, vector<1x128xi32>
    %c0_2 = arith.constant 0 : index
    %c0_3 = arith.constant 0 : index
    %4 = vector.load %arg1[%c0_2, %c0_3] : memref<5x128xf32, #tpu.memory_space<vmem>>, vector<1x128xf32>
    %c1 = arith.constant 1 : index
    %c0_4 = arith.constant 0 : index
    %5 = vector.load %arg1[%c1, %c0_4] : memref<5x128xf32, #tpu.memory_space<vmem>>, vector<1x128xf32>
    %c2 = arith.constant 2 : index
    %c0_5 = arith.constant 0 : index
    %6 = vector.load %arg1[%c2, %c0_5] : memref<5x128xf32, #tpu.memory_space<vmem>>, vector<1x128xf32>
    %c3 = arith.constant 3 : index
    %c0_6 = arith.constant 0 : index
    %7 = vector.load %arg1[%c3, %c0_6] : memref<5x128xf32, #tpu.memory_space<vmem>>, vector<1x128xf32>
    %c4 = arith.constant 4 : index
    %c0_7 = arith.constant 0 : index
    %8 = vector.load %arg1[%c4, %c0_7] : memref<5x128xf32, #tpu.memory_space<vmem>>, vector<1x128xf32>
    %9 = arith.maximumf %4, %5 : vector<1x128xf32>
    %10 = arith.maximumf %9, %6 : vector<1x128xf32>
    %11 = arith.maximumf %10, %7 : vector<1x128xf32>
    %12 = arith.maximumf %11, %8 : vector<1x128xf32>
    %13 = arith.subf %4, %12 : vector<1x128xf32>
    %14 = arith.subf %5, %12 : vector<1x128xf32>
    %15 = arith.subf %6, %12 : vector<1x128xf32>
    %16 = arith.subf %7, %12 : vector<1x128xf32>
    %17 = arith.subf %8, %12 : vector<1x128xf32>
    %18 = math.exp %13 : vector<1x128xf32>
    %19 = math.exp %14 : vector<1x128xf32>
    %20 = arith.addf %18, %19 : vector<1x128xf32>
    %21 = math.exp %15 : vector<1x128xf32>
    %22 = arith.addf %20, %21 : vector<1x128xf32>
    %23 = math.exp %16 : vector<1x128xf32>
    %24 = arith.addf %22, %23 : vector<1x128xf32>
    %25 = math.exp %17 : vector<1x128xf32>
    %26 = arith.addf %24, %25 : vector<1x128xf32>
    %27 = math.log %26 : vector<1x128xf32>
    %cst = arith.constant 0.000000e+00 : f32
    %28 = vector.broadcast %cst : f32 to vector<1x128xf32>
    %c0_i32_8 = arith.constant 0 : i32
    %29 = vector.broadcast %c0_i32_8 : i32 to vector<1x128xi32>
    %30 = arith.cmpi eq, %3, %29 : vector<1x128xi32>
    %31 = arith.subf %13, %27 : vector<1x128xf32>
    %cst_9 = arith.constant 0.000000e+00 : f32
    %32 = vector.broadcast %cst_9 : f32 to vector<1x128xf32>
    %33 = arith.select %30, %31, %32 : vector<1x128xi1>, vector<1x128xf32>
    %34 = arith.addf %28, %33 : vector<1x128xf32>
    %c1_i32 = arith.constant 1 : i32
    %35 = vector.broadcast %c1_i32 : i32 to vector<1x128xi32>
    %36 = arith.cmpi eq, %3, %35 : vector<1x128xi32>
    %37 = arith.subf %14, %27 : vector<1x128xf32>
    %cst_10 = arith.constant 0.000000e+00 : f32
    %38 = vector.broadcast %cst_10 : f32 to vector<1x128xf32>
    %39 = arith.select %36, %37, %38 : vector<1x128xi1>, vector<1x128xf32>
    %40 = arith.addf %34, %39 : vector<1x128xf32>
    %c2_i32 = arith.constant 2 : i32
    %41 = vector.broadcast %c2_i32 : i32 to vector<1x128xi32>
    %42 = arith.cmpi eq, %3, %41 : vector<1x128xi32>
    %43 = arith.subf %15, %27 : vector<1x128xf32>
    %cst_11 = arith.constant 0.000000e+00 : f32
    %44 = vector.broadcast %cst_11 : f32 to vector<1x128xf32>
    %45 = arith.select %42, %43, %44 : vector<1x128xi1>, vector<1x128xf32>
    %46 = arith.addf %40, %45 : vector<1x128xf32>
    %c3_i32 = arith.constant 3 : i32
    %47 = vector.broadcast %c3_i32 : i32 to vector<1x128xi32>
    %48 = arith.cmpi eq, %3, %47 : vector<1x128xi32>
    %49 = arith.subf %16, %27 : vector<1x128xf32>
    %cst_12 = arith.constant 0.000000e+00 : f32
    %50 = vector.broadcast %cst_12 : f32 to vector<1x128xf32>
    %51 = arith.select %48, %49, %50 : vector<1x128xi1>, vector<1x128xf32>
    %52 = arith.addf %46, %51 : vector<1x128xf32>
    %c4_i32 = arith.constant 4 : i32
    %53 = vector.broadcast %c4_i32 : i32 to vector<1x128xi32>
    %54 = arith.cmpi eq, %3, %53 : vector<1x128xi32>
    %55 = arith.subf %17, %27 : vector<1x128xf32>
    %cst_13 = arith.constant 0.000000e+00 : f32
    %56 = vector.broadcast %cst_13 : f32 to vector<1x128xf32>
    %57 = arith.select %54, %55, %56 : vector<1x128xi1>, vector<1x128xf32>
    %58 = arith.addf %52, %57 : vector<1x128xf32>
    %cst_14 = arith.constant 1.000000e-01 : f32
    %59 = vector.broadcast %cst_14 : f32 to vector<1x128xf32>
    %60 = arith.mulf %59, %58 : vector<1x128xf32>
    %cst_15 = arith.constant 0.000000e+00 : f32
    %61 = vector.broadcast %cst_15 : f32 to vector<1x128xf32>
    %62 = arith.subf %61, %60 : vector<1x128xf32>
    %cst_16 = arith.constant -16.1180954 : f32
    %63 = vector.broadcast %cst_16 : f32 to vector<1x128xf32>
    %64 = arith.maximumf %58, %63 : vector<1x128xf32>
    %cst_17 = arith.constant 1.000000e+00 : f32
    %65 = vector.broadcast %cst_17 : f32 to vector<1x128xf32>
    %66 = arith.mulf %65, %64 : vector<1x128xf32>
    %67 = arith.subf %62, %66 : vector<1x128xf32>
    %c0_18 = arith.constant 0 : index
    %c0_19 = arith.constant 0 : index
    %68 = vector.load %arg4[%c0_18, %c0_19] : memref<1x128xf32, #tpu.memory_space<vmem>>, vector<1x128xf32>
    %69 = arith.addf %68, %67 : vector<1x128xf32>
    %c0_20 = arith.constant 0 : index
    %c0_21 = arith.constant 0 : index
    %70 = vector.load %arg4[%c0_20, %c0_21] : memref<1x128xf32, #tpu.memory_space<vmem>>, vector<1x128xf32>
    tpu.vector_store %arg4[%c0_20, %c0_21], %69 {strides = array<i32>} : memref<1x128xf32, #tpu.memory_space<vmem>>, vector<1x128xf32>,
    %c0_i32_22 = arith.constant 0 : i32
    %71 = arith.cmpi eq, %arg0, %c0_i32_22 : i32
    %72 = arith.extui %71 : i1 to i32
    %c0_i32_23 = arith.constant 0 : i32
    %73 = arith.cmpi ne, %72, %c0_i32_23 : i32
    scf.if %73 {
      %c0_24 = arith.constant 0 : index
      %c0_25 = arith.constant 0 : index
      %74 = vector.load %arg4[%c0_24, %c0_25] : memref<1x128xf32, #tpu.memory_space<vmem>>, vector<1x128xf32>
      %75 = vector.shape_cast %74 : vector<1x128xf32> to vector<1x1x128xf32>
      %cst_26 = arith.constant dense<0.000000e+00> : vector<1xf32>
      %76 = vector.multi_reduction <add>, %75, %cst_26 [1, 2] : vector<1x1x128xf32> to vector<1xf32>
      %77 = vector.shape_cast %76 : vector<1xf32> to vector<1x1x1xf32>
      %78 = vector.extract %77[0, 0, 0] : f32 from vector<1x1x1xf32>
      %cst_27 = arith.constant 1.250000e-01 : f32
      %79 = arith.mulf %78, %cst_27 : f32
      %c0_28 = arith.constant 0 : index
      %c0_29 = arith.constant 0 : index
      %80 = memref.load %arg3[%c0_28, %c0_29] : memref<1x1xf32, #tpu.memory_space<smem>>
      memref.store %79, %arg3[%c0_28, %c0_29] : memref<1x1xf32, #tpu.memory_space<smem>>
    } else {
    }
    return
  }
  func.func @transform_0(%arg0: i32) -> (i32, i32) {
    %c0_i32 = arith.constant 0 : i32
    %c0_i32_0 = arith.constant 0 : i32
    return %c0_i32, %arg0 : i32, i32
  }
  func.func @transform_1(%arg0: i32) -> (i32, i32) {
    %c0_i32 = arith.constant 0 : i32
    %c0_i32_0 = arith.constant 0 : i32
    return %c0_i32, %arg0 : i32, i32
  }
  func.func @transform_2(%arg0: i32) -> (i32, i32) {
    %c0_i32 = arith.constant 0 : i32
    %c0_i32_0 = arith.constant 0 : i32
    %c0_i32_1 = arith.constant 0 : i32
    return %c0_i32, %c0_i32_0 : i32, i32
  }
}

</mosaic_0001>

<bundles_post_ra>
// kernel: tpu_custom_call.1
= control target key start
LH: loop header
LB: loop body
LE: loop exit
PB: predicated region body
PF: predicated region fallthrough
CT: control target
= control target key end

     0   :  { %7 = vsyncpa [#allocation4], 0  ;;  %s217_s0 = inlined_call_operand.hbm [shape: f32[5,128], index: 0, kind: input, shape index: {}]   ;;  %s218_s1 = inlined_call_operand.vmem [shape: s32[1,128], index: 1, kind: input, shape index: {}]   ;;  %s219_s2 = inlined_call_operand.hbm [shape: f32[1,1], index: 2, kind: output, shape index: {}]  }
   0x1   :  { %8 = vsyncpa [#allocation5], 0  ;;  %s172_s9 = smov [#allocation3]   ;;  %s136_s13 = scalar_lea.hbm %s217_s0, 128 }
   0x2   :  { %s15_s10 = sshll.u32 %s172_s9, 4  ;;  %p137_p0 = scmp.ne.s32.totalorder %s217_s0, %s136_s13  ;;  %s16_s10 = int_to_ptr.vmem [resolvable:$true] %s15_s10 }
   0x3   :  { %p140_p1 = scmp.lt.u32.totalorder %s136_s13, %s217_s0 }
   0x5   :  { %p142_p2 = pnand %p140_p1, %p137_p0 }
   0x7   :  { %145 = shalt.err (!%p142_p2)
}
   0x8   :  { %s146_s18 = scalar_lea.vmem %s16_s10, 128  ;;  %p151_p4 = scmp.lt.s32.totalorder %s16_s10, %s16_s10 }
   0x9   :  { %p147_p3 = scmp.ne.s32.totalorder %s16_s10, %s146_s18  ;;  %p152_p5 = scmp.lt.s32.totalorder %s146_s18, %s146_s18 }
   0xb   :  { %p153_p6 = por %p152_p5, %p151_p4 }
   0xd   :  { %p154_p7 = pnand %p153_p6, %p147_p3 }
   0xf   :  { %157 = shalt.err (!%p154_p7)
}
  0x10   :  { %18 = dma.hbm_to_vmem [thread:$0]  %s217_s0, 128, %s16_s10, [#allocation4]  }
  0x11   :  { %168 = dma.done.wait [#allocation4], 128  }
  0x12   :  { %169 = vsyncadd [#allocation4], 4294967168  ;;  %v173_v0 = vmov 0.0   ;;  %v30_v1 = vld [vmem:[#allocation3] sm:$0x1]  ;;  %vm91_vm5 = vcmask 1040384  }
  0x13   :  { %28 = vst [vmem:[#allocation2] sm:$0x1] %v173_v0  ;;  %v31_v2 = vld [vmem:[#allocation3 + $0x1] sm:$0x1]  ;;  %v32_v3 = vld [vmem:[#allocation3 + $0x2] sm:$0x1] }
  0x14   :  { %v35_v4 = vmax.f32 %v30_v1, %v31_v2  ;;  %v33_v5 = vld [vmem:[#allocation3 + $0x3] sm:$0x1]  ;;  %v34_v7 = vld [vmem:[#allocation3 + $0x4] sm:$0x1]  ;;  %v29_v29 = vld [vmem:[%s218_s1] sm:$0x1] }
  0x15   :  { %vm60_vm0 = vcmp.eq.s32.totalorder %v29_v29, 0  ;;  %vm64_vm1 = vcmp.eq.s32.totalorder %v29_v29, 1  ;;  %vm68_vm2 = vcmp.eq.s32.totalorder %v29_v29, 2  ;;  %vm72_vm3 = vcmp.eq.s32.totalorder %v29_v29, 3  ;;  %s158_s25 = scalar_lea.hbm %s219_s2, 16 }
  0x16   :  { %v36_v6 = vmax.f32 %v35_v4, %v32_v3  ;;  %vm76_vm4 = vcmp.eq.s32.totalorder %v29_v29, 4  ;;  %p159_p8 = scmp.ne.s32.totalorder %s219_s2, %s158_s25  ;;  %p162_p9 = scmp.lt.u32.totalorder %s158_s25, %s219_s2 }
  0x18   :  { %v37_v8 = vmax.f32 %v36_v6, %v33_v5  ;;  %p164_p10 = pnand %p162_p9, %p159_p8 }
  0x1a   :  { %v38_v9 = vmax.f32 %v37_v8, %v34_v7  ;;  %v84_v49 = vld [vmem:[#allocation2] sm:$0x1] }
  0x1c   :  { %v39_v10 = vsub.f32 %v30_v1, %v38_v9  ;;  %v40_v11 = vsub.f32 %v31_v2, %v38_v9  ;;  %v41_v12 = vsub.f32 %v32_v3, %v38_v9  ;;  %v42_v13 = vsub.f32 %v33_v5, %v38_v9 }
  0x1d   :  { %v43_v14 = vsub.f32 %v34_v7, %v38_v9 }
  0x1e   :  { %v44_v15 = vmul.f32 1.442695, %v39_v10  ;;  %v46_v16 = vmul.f32 1.442695, %v40_v11  ;;  %v49_v17 = vmul.f32 1.442695, %v41_v12 }
  0x1f   :  { %v52_v18 = vmul.f32 1.442695, %v42_v13  ;;  %v55_v19 = vmul.f32 1.442695, %v43_v14 }
  0x20   :  { %124 = vpow2.f32 %v44_v15 }
  0x21   :  { %126 = vpow2.f32 %v46_v16 }
  0x22   :  { %128 = vpow2.f32 %v49_v17 }
  0x23   :  { %130 = vpow2.f32 %v52_v18 }
  0x24   :  { %132 = vpow2.f32 %v55_v19 }
  0x2a   :  { %v125_v20 = vpop.eup %124 }
  0x2b   :  { %v127_v21 = vpop.eup %126 }
  0x2c   :  { %v129_v22 = vpop.eup %128  ;;  %v48_v23 = vadd.f32 %v127_v21, %v125_v20 }
  0x2d   :  { %v131_v24 = vpop.eup %130 }
  0x2e   :  { %v51_v25 = vadd.f32 %v129_v22, %v48_v23  ;;  %v133_v26 = vpop.eup %132 }
  0x30   :  { %v54_v27 = vadd.f32 %v131_v24, %v51_v25 }
  0x32   :  { %v57_v28 = vadd.f32 %v133_v26, %v54_v27 }
  0x34   :  { %134 = vlog2.f32 %v57_v28 }
  0x3e   :  { %v135_v30 = vpop.eup %134 }
  0x3f   :  { %v59_v31 = vmul.f32 0.6931472, %v135_v30 }
  0x41   :  { %v61_v32 = vsub.f32 %v39_v10, %v59_v31  ;;  %v65_v33 = vsub.f32 %v40_v11, %v59_v31  ;;  %v69_v34 = vsub.f32 %v41_v12, %v59_v31  ;;  %v73_v35 = vsub.f32 %v42_v13, %v59_v31 }
  0x42   :  { %v77_v39 = vsub.f32 %v43_v14, %v59_v31 }
  0x43   :  { %v62_v36 = vsel %vm60_vm0, %v61_v32, 0.0  ;;  %v66_v37 = vsel %vm64_vm1, %v65_v33, 0.0  ;;  %v70_v38 = vsel %vm68_vm2, %v69_v34, 0.0  ;;  %v74_v41 = vsel %vm72_vm3, %v73_v35, 0.0 }
  0x44   :  { %v67_v40 = vadd.f32 %v66_v37, %v62_v36  ;;  %v78_v43 = vsel %vm76_vm4, %v77_v39, 0.0 }
  0x46   :  { %v71_v42 = vadd.f32 %v70_v38, %v67_v40 }
  0x48   :  { %v75_v44 = vadd.f32 %v74_v41, %v71_v42 }
  0x4a   :  { %v79_v45 = vadd.f32 %v78_v43, %v75_v44 }
  0x4c   :  { %v80_v46 = vmul.f32 0.1, %v79_v45  ;;  %v82_v47 = vmax.f32 %v79_v45, -16.118095 }
  0x4e   :  { %v81_v48 = vsub.f32 0.0, %v80_v46 }
  0x50   :  { %v83_v50 = vsub.f32 %v81_v48, %v82_v47 }
  0x52   :  { %v85_v51 = vadd.f32 %v84_v49, %v83_v50 }
  0x54   :  { %86 = vst [vmem:[#allocation2] sm:$0x1] %v85_v51 }
  0x5b   :  { %v90_v52 = vld [vmem:[#allocation2] sm:$0x1] }
  0x5c   :  { %v92_v53 = vsel %vm91_vm5, %v90_v52, 0.0 }
  0x5d   :  { %93 = vadd.xlane.f32.xlu0 %v92_v53 }
  0xea   :  { %v94_v54 = vpop.xlane.xlu0 %93 }
  0xeb   :  { %v95_v55 = vrot.slane %v94_v54, 4 }
  0xed   :  { %v96_v56 = vadd.f32 %v95_v55, %v94_v54 }
  0xef   :  { %v97_v57 = vrot.slane %v96_v56, 2 }
  0xf1   :  { %v98_v58 = vadd.f32 %v97_v57, %v96_v56 }
  0xf3   :  { %v99_v59 = vrot.slane %v98_v58, 1 }
  0xf5   :  { %v100_v60 = vadd.f32 %v99_v59, %v98_v58 }
  0xf7   :  { %119 = vpush %v100_v60 }
 0x128   :  { %s120_s1 = spop %119 }
 0x129   :  { %s102_s22 = smul.f32 0.125, %s120_s1 }
 0x12b   :  { %104 = sst [smem:[#allocation6]] %s102_s22 }
 0x12c   :  { %167 = shalt.err (!%p164_p10)
}
 0x12d   :  { %s174_s30 = smov [#allocation6]  }
 0x12e   :  { %112 = dma.smem_to_hbm %s174_s30, 16, %s219_s2, [#allocation5]  }
 0x12f   :  { %170 = dma.done.wait [#allocation5], 16  }
 0x130   :  { %171 = vsyncadd [#allocation5], 4294967280 }
 0x131   :  { %116 = sfence }
 0x132   :  { %117 = vsyncpa [#allocation4], 1 }
 0x133   :  { %118 = vsyncpa [#allocation5], 1 }

</bundles_post_ra>
